<compile_context>
chip_gen: v7x
topology: tpu7x:2x2x1
jax: 0.10.0
libtpu: 0.0.40
codegen_flags: <defaults>
</compile_context>

<pallas_src>
import functools

import jax
import jax.numpy as jnp
from jax.experimental import pallas as pl
from jax.experimental.pallas import tpu as pltpu

EPS = 1e-5
NUM_LEVELS = 5          # the provided UnetGenerator body hardcodes 5 nested blocks

TM = 1024               # max rows per tile
TN_SMALL, TN_LARGE = 256, 512
TK = 512
VMEM_LIMIT = 32 * 1024 * 1024


def _round_up(x, m):
    return (x + m - 1) // m * m


# ---------------------------------------------------------------------------
# The Pallas kernel: tiled matmul + bias (+tanh) + fused BN-stat partial sums.
# ---------------------------------------------------------------------------
def _mm_kernel(x_ref, w_ref, b_ref, o_ref, stats_ref, acc_ref, *, post_tanh):
    @pl.when(pl.program_id(2) == 0)
    def _():
        acc_ref[...] = jnp.zeros_like(acc_ref)

    acc_ref[...] += jnp.dot(x_ref[...], w_ref[...],
                            preferred_element_type=jnp.float32)

    @pl.when(pl.program_id(2) == pl.num_programs(2) - 1)
    def _():
        r = acc_ref[...] + b_ref[...]
        if post_tanh:
            r = jnp.tanh(r)
        o_ref[...] = r.astype(o_ref.dtype)
        # Per-channel partial [sum; sum_sq] for the deferred BatchNorm, taken straight
        # from the f32 accumulator -> no separate stats pass over HBM.
        stats_ref[...] = jnp.concatenate(
            [jnp.sum(r, axis=0, keepdims=True),
             jnp.sum(r * r, axis=0, keepdims=True)],
            axis=0).reshape(1, 2, r.shape[1])


# ---------------------------------------------------------------------------
# Adaptive tile selection (prefers exact divisors; full-extent blocks for
# non-128-multiple dims so nothing is zero-padded unnecessarily).
# ---------------------------------------------------------------------------
def _pick_m(m):
    mp = _round_up(m, 8)
    if mp <= TM:
        return mp, mp
    for t in range(TM, 255, -8):
        if mp % t == 0:
            return t, mp
    return TM, _round_up(mp, TM)        # rare fallback: pad M


def _pick_n(c):
    if c % 128 != 0:
        if c <= 1024:
            return c, c                 # full-extent lanes: no pad, no output slice
        cp = _round_up(c, 128)
    else:
        cp = c
    cap = TN_LARGE if cp >= TN_LARGE else TN_SMALL
    for t in range(min(cap, cp), 127, -128):
        if cp % t == 0:
            return t, cp
    return 128, cp


def _pick_k(k):
    if k % 128 != 0:
        if k <= 2048:
            return k, k                 # full-extent K block: no zero-MACs
        kp = _round_up(k, 128)
    else:
        kp = k
    for t in range(min(TK, kp), 127, -128):
        if kp % t == 0:
            return t, kp
    return 128, kp


def _pallas_matmul(patches, wmat, bias, post_tanh=False, out_dtype=jnp.bfloat16):
    """out = [tanh](patches @ wmat + bias); also returns per-column [sum, sum_sq]."""
    m, k = patches.shape
    c = wmat.shape[1]
    tm, mp = _pick_m(m)
    tn, cp = _pick_n(c)
    tk, kp = _pick_k(k)
    if (mp, kp) != (m, k):
        patches = jnp.pad(patches, ((0, mp - m), (0, kp - k)))
    if (kp, cp) != (k, c):
        wmat = jnp.pad(wmat, ((0, kp - k), (0, cp - c)))
    b2 = bias.astype(jnp.float32).reshape(1, c)
    if cp != c:
        b2 = jnp.pad(b2, ((0, 0), (0, cp - c)))
    ni = mp // tm

    out, stats = pl.pallas_call(
        functools.partial(_mm_kernel, post_tanh=post_tanh),
        out_shape=(jax.ShapeDtypeStruct((mp, cp), out_dtype),
                   jax.ShapeDtypeStruct((ni, 2, cp), jnp.float32)),
        grid=(ni, cp // tn, kp // tk),
        in_specs=[
            pl.BlockSpec((tm, tk), lambda i, j, kk: (i, kk)),
            pl.BlockSpec((tk, tn), lambda i, j, kk: (kk, j)),
            pl.BlockSpec((1, tn), lambda i, j, kk: (0, j)),
        ],
        out_specs=(
            pl.BlockSpec((tm, tn), lambda i, j, kk: (i, j)),
            pl.BlockSpec((1, 2, tn), lambda i, j, kk: (i, 0, j)),
        ),
        scratch_shapes=[pltpu.VMEM((tm, tn), jnp.float32)],
        compiler_params=pltpu.CompilerParams(
            dimension_semantics=("parallel", "parallel", "arbitrary"),
            vmem_limit_bytes=VMEM_LIMIT),
    )(patches, wmat, b2)

    if (mp, cp) != (m, c):
        out = out[:m, :c]
    sums = jnp.sum(stats, axis=0)       # (2, cp): reduce the row-tile partials
    if cp != c:
        sums = sums[:, :c]
    return out, sums


# ---------------------------------------------------------------------------
# Patch construction (XLA): deferred BN affine + activation fused in; multi-segment
# (skip-concat-free) channel concatenation happens per tap.
# ---------------------------------------------------------------------------
def _affine_act(x, scale, shift, act):
    xf = x.astype(jnp.float32)
    if scale is not None:
        xf = xf * scale + shift
    if act == "lrelu":
        xf = jnp.where(xf > 0, xf, 0.2 * xf)
    elif act == "relu":
        xf = jnp.maximum(xf, 0.0)
    return xf.astype(jnp.bfloat16)


def _im2col(xps, k):
    """Stride-1 im2col over a list of (N,Hp,Wp,Ci) arrays, channel-concat per tap."""
    n, hp, wp = xps[0].shape[:3]
    ho, wo = hp - k + 1, wp - k + 1
    taps = []
    for di in range(k):
        for dj in range(k):
            sl = [xp[:, di:di + ho, dj:dj + wo, :] for xp in xps]
            taps.append(sl[0] if len(sl) == 1 else jnp.concatenate(sl, axis=-1))
    patches = jnp.stack(taps, axis=3)               # (N, Ho, Wo, k*k, Ct)
    ct = patches.shape[-1]
    return patches.reshape(n * ho * wo, k * k * ct), (n, ho, wo)


# ---------------------------------------------------------------------------
# Conv2d(4, stride=2, padding=1)  -- space-to-depth -> 2x2/stride-1 conv
# ---------------------------------------------------------------------------
def conv2d_s2(x, w, scale=None, shift=None, act="none"):
    """x: NHWC, w: (Cout, Cin, 4, 4).  Returns (y bf16, [sum,sum_sq], count)."""
    n, h, wd, cin = x.shape
    assert h % 2 == 0 and wd % 2 == 0
    cout = w.shape[0]
    xa = _affine_act(x, scale, shift, act)                  # BN/act before zero pad
    xp = jnp.pad(xa, ((0, 0), (1, 1), (1, 1), (0, 0)))
    hs, ws = (h + 2) // 2, (wd + 2) // 2
    xs = (xp.reshape(n, hs, 2, ws, 2, cin)
            .transpose(0, 1, 3, 2, 4, 5)
            .reshape(n, hs, ws, 4 * cin))                   # space-to-depth
    patches, (n2, ho, wo) = _im2col([xs], 2)                # (N*Ho*Wo, 16*Cin)
    # w[cout,cin,2u+p,2v+q] -> rows ordered (u,v,p,q,cin) to match patch columns
    wmat = (w.reshape(cout, cin, 2, 2, 2, 2)
             .transpose(2, 4, 3, 5, 1, 0)
             .reshape(16 * cin, cout).astype(jnp.bfloat16))
    out, sums = _pallas_matmul(patches, wmat, jnp.zeros((cout,), jnp.float32))
    return out.reshape(n2, ho, wo, cout), sums, n2 * ho * wo


# ---------------------------------------------------------------------------
# ConvTranspose2d(4, stride=2, padding=1) -- all 4 output phases from one matmul
# over the shared 3x3 tap window, then a depth-to-space reshape.
# ---------------------------------------------------------------------------
def _convT_w9(w):
    """(Cin, Cout, 4, 4) -> (9*Cin, 4*Cout); column group (py,px) holds that phase."""
    cin, cout = w.shape[0], w.shape[1]
    zero = jnp.zeros((cin, cout), w.dtype)
    rows = []
    for c in range(3):
        for d in range(3):
            cols = []
            for py in range(2):
                for px in range(2):
                    a, b = c - py, d - px
                    if 0 <= a <= 1 and 0 <= b <= 1:
                        cols.append(w[:, :, 3 - py - 2 * a, 3 - px - 2 * b])
                    else:
                        cols.append(zero)
            rows.append(jnp.concatenate(cols, axis=1))      # (Cin, 4*Cout)
    return jnp.concatenate(rows, axis=0)                    # (9*Cin, 4*Cout)


def conv_transpose2d_s2(segments, w, bias=None, act="relu",
                        post_tanh=False, out_dtype=jnp.bfloat16):
    """segments: list of (x NHWC, scale, shift); their channel concat (never
    materialized) is the layer input.  w: (Cin_total, Cout, 4, 4)."""
    n, h, wd = segments[0][0].shape[:3]
    cin_tot = sum(s[0].shape[-1] for s in segments)
    assert cin_tot == w.shape[0]
    cout = w.shape[1]
    xps = [jnp.pad(_affine_act(x, sc, sh, act), ((0, 0), (1, 1), (1, 1), (0, 0)))
           for (x, sc, sh) in segments]
    patches, _ = _im2col(xps, 3)                            # (N*H*W, 9*Cin_total)
    w9 = _convT_w9(w).astype(jnp.bfloat16)                  # (9*Cin_total, 4*Cout)
    b = jnp.zeros((cout,), jnp.float32) if bias is None else bias
    z, sums = _pallas_matmul(patches, w9, jnp.tile(b, 4), post_tanh, out_dtype)
    out = (z.reshape(n, h, wd, 2, 2, cout)
             .transpose(0, 1, 3, 2, 4, 5)
             .reshape(n, 2 * h, 2 * wd, cout))              # depth-to-space
    sums = jnp.sum(sums.reshape(2, 4, cout), axis=1)        # merge the 4 phases
    return out, sums, n * 4 * h * wd


# ---------------------------------------------------------------------------
# Deferred BatchNorm (training mode, biased var, eps=1e-5): fold into scale/shift.
# ---------------------------------------------------------------------------
def _fold_bn(sums, count, gamma, beta):
    mean = sums[0] / count
    var = jnp.maximum(sums[1] / count - mean * mean, 0.0)
    scale = gamma * jax.lax.rsqrt(var + EPS)
    shift = beta - mean * scale
    return scale, shift


# ---------------------------------------------------------------------------
# UnetSkipConnectionBlock / UnetGenerator forward (BN folded into consumers;
# skip concat carried as segments, never materialized).
# ---------------------------------------------------------------------------
def _run_block(x, x_scale, x_shift, p, level):
    outermost = level == 0
    innermost = level == NUM_LEVELS - 1

    # down: [LeakyReLU?] downconv [downnorm -> deferred]
    d_raw, d_sums, d_cnt = conv2d_s2(
        x, p["down_w"], scale=x_scale, shift=x_shift,
        act="none" if outermost else "lrelu")
    if (not outermost) and (not innermost):
        d_scale, d_shift = _fold_bn(d_sums, d_cnt, p["dn_gamma"], p["dn_beta"])
    else:
        d_scale = d_shift = None            # no downnorm on outermost / innermost

    if innermost:
        up_in = [(d_raw, d_scale, d_shift)]
    else:
        up_in = _run_block(d_raw, d_scale, d_shift, p["sub"], level + 1)

    # up: [ReLU] upconv [upnorm -> deferred | Tanh]
    if outermost:
        out, _, _ = conv_transpose2d_s2(up_in, p["up_w"], bias=p["up_b"],
                                        act="relu", post_tanh=True,
                                        out_dtype=jnp.float32)
        return out
    u_raw, u_sums, u_cnt = conv_transpose2d_s2(up_in, p["up_w"], act="relu")
    u_scale, u_shift = _fold_bn(u_sums, u_cnt, p["up_gamma"], p["up_beta"])
    # skip: cat([x, model(x)], C) represented as two segments with their own folds
    return [(x, x_scale, x_shift), (u_raw, u_scale, u_shift)]


def unet_forward(x_nchw, params):
    n, c, h, w = x_nchw.shape
    assert h % (2 ** NUM_LEVELS) == 0 and w % (2 ** NUM_LEVELS) == 0
    x = jnp.transpose(x_nchw, (0, 2, 3, 1))                 # NCHW -> NHWC
    y = _run_block(x, None, None, params, 0)
    return jnp.transpose(y, (0, 3, 1, 2)).astype(jnp.float32)


# ---------------------------------------------------------------------------
# Deterministic parameter init (shapes match the PyTorch module; BatchNorm ->
# conv biases off except the outermost ConvTranspose2d which keeps its bias).
# ---------------------------------------------------------------------------
def init_params(key, input_nc, output_nc, ngf):
    inner_mult = [1, 2, 4, 8, 8]
    outer_mult = [None, 1, 2, 4, 8]

    def cfg(level):
        if level == 0:
            return input_nc, ngf, output_nc
        return ngf * outer_mult[level], ngf * inner_mult[level], ngf * outer_mult[level]

    def make(level, k):
        in_nc, inner, outer = cfg(level)
        innermost = level == NUM_LEVELS - 1
        outermost = level == 0
        k1, k2, k3, k4 = jax.random.split(k, 4)
        p = {"down_w": 0.02 * jax.random.normal(k1, (inner, in_nc, 4, 4), jnp.float32)}
        up_in = inner if innermost else inner * 2
        p["up_w"] = 0.02 * jax.random.normal(k2, (up_in, outer, 4, 4), jnp.float32)
        if outermost:
            p["up_b"] = 0.02 * jax.random.normal(k3, (outer,), jnp.float32)
        else:
            p["up_gamma"] = jnp.ones((outer,), jnp.float32)
            p["up_beta"] = jnp.zeros((outer,), jnp.float32)
            if not innermost:
                p["dn_gamma"] = jnp.ones((inner,), jnp.float32)
                p["dn_beta"] = jnp.zeros((inner,), jnp.float32)
        if not innermost:
            p["sub"] = make(level + 1, k4)
        return p

    return make(0, key)


# ---------------------------------------------------------------------------
# Pure-XLA f32 reference (mirrors the PyTorch forward) for numerical validation.
# ---------------------------------------------------------------------------
def _ref_conv(x, w):
    return jax.lax.conv_general_dilated(
        x, jnp.transpose(w, (2, 3, 1, 0)), (2, 2), ((1, 1), (1, 1)),
        dimension_numbers=("NHWC", "HWIO", "NHWC"))


def _ref_convT(x, w, b=None):
    y = jax.lax.conv_general_dilated(
        x, jnp.transpose(w[:, :, ::-1, ::-1], (2, 3, 0, 1)), (1, 1),
        ((2, 2), (2, 2)), lhs_dilation=(2, 2),
        dimension_numbers=("NHWC", "HWIO", "NHWC"))
    return y if b is None else y + b


def _ref_bn(x, gamma, beta):
    mean = jnp.mean(x, axis=(0, 1, 2))
    var = jnp.mean((x - mean) ** 2, axis=(0, 1, 2))
    return (x - mean) * jax.lax.rsqrt(var + EPS) * gamma + beta


def _ref_block(x, p, level):
    outermost = level == 0
    innermost = level == NUM_LEVELS - 1
    h = x if outermost else jnp.where(x > 0, x, 0.2 * x)
    d = _ref_conv(h, p["down_w"])
    if (not outermost) and (not innermost):
        d = _ref_bn(d, p["dn_gamma"], p["dn_beta"])
    mid = d if innermost else _ref_block(d, p["sub"], level + 1)
    u = _ref_convT(jnp.maximum(mid, 0.0), p["up_w"], p.get("up_b"))
    if outermost:
        return jnp.tanh(u)
    u = _ref_bn(u, p["up_gamma"], p["up_beta"])
    return jnp.concatenate([x, u], axis=-1)


def ref_unet(x_nchw, params):
    x = jnp.transpose(x_nchw, (0, 2, 3, 1))
    return jnp.transpose(_ref_block(x, params, 0), (0, 3, 1, 2))


# ---------------------------------------------------------------------------
if __name__ == "__main__":
    key = jax.random.PRNGKey(0)
    kp, kx, k1, k2, k3 = jax.random.split(key, 5)

    # --- primitive checks: Pallas conv / transpose-conv vs. XLA f32 reference ---
    xc = jax.random.normal(k1, (2, 8, 8, 8), jnp.float32)
    wc = 0.1 * jax.random.normal(k2, (8, 8, 4, 4), jnp.float32)
    y_pl, _, _ = jax.jit(lambda a, b: conv2d_s2(a, b))(xc, wc)
    y_rf = _ref_conv(xc, wc)
    rel = float(jnp.max(jnp.abs(y_pl.astype(jnp.float32) - y_rf))
                / (jnp.max(jnp.abs(y_rf)) + 1e-6))
    assert rel < 0.05, rel

    wt = 0.1 * jax.random.normal(k3, (8, 8, 4, 4), jnp.float32)
    yt_pl, _, _ = jax.jit(
        lambda a, b: conv_transpose2d_s2([(a, None, None)], b, act="none"))(xc, wt)
    yt_rf = _ref_convT(xc, wt)
    relt = float(jnp.max(jnp.abs(yt_pl.astype(jnp.float32) - yt_rf))
                 / (jnp.max(jnp.abs(yt_rf)) + 1e-6))
    assert relt < 0.05, relt

    # --- full model ---
    input_nc, output_nc, ngf = 3, 3, 8
    N, H, W = 2, 32, 32      # 5 downsamplings -> innermost spatial = 1x1

    params = init_params(kp, input_nc, output_nc, ngf)
    x = jax.random.normal(kx, (N, input_nc, H, W), jnp.float32)

    fwd = jax.jit(lambda inp: unet_forward(inp, params))
    y = fwd(x)
    jax.block_until_ready(y)

    assert y.shape == (N, output_nc, H, W), y.shape
    assert bool(jnp.all(jnp.isfinite(y)))
    assert bool(jnp.all(jnp.abs(y) <= 1.0 + 1e-6))          # final Tanh bound

    y_ref = jax.jit(lambda inp: ref_unet(inp, params))(x)   # f32 XLA reference
    max_err = float(jnp.max(jnp.abs(y - y_ref)))
    assert max_err < 0.25, max_err                          # bf16 internals tolerance

    print("KERNEL_OK")
</pallas_src>

<mosaic_0001>
module attributes {stable_mosaic.version = 11 : i64} {
  func.func @_mm_kernel(%arg0: i32, %arg1: i32, %arg2: i32, %arg3: memref<32x128xbf16, #tpu.memory_space<vmem>>, %arg4: memref<128x8xbf16, #tpu.memory_space<vmem>>, %arg5: memref<1x8xf32, #tpu.memory_space<vmem>>, %arg6: memref<32x8xbf16, #tpu.memory_space<vmem>>, %arg7: memref<1x2x8xf32, #tpu.memory_space<vmem>>, %arg8: memref<32x8xf32, #tpu.memory_space<vmem>>) attributes {dimension_semantics = [#tpu.dimension_semantics<parallel>, #tpu.dimension_semantics<parallel>, #tpu.dimension_semantics<arbitrary>], iteration_bounds = array<i64: 1, 1, 1>, scalar_prefetch = 0 : i64, scratch_operands = 1 : i64, tpu.core_type = #tpu.core_type<tc>, window_params = [{transform_indices = @transform_0, window_bounds = array<i64: 32, 128>}, {transform_indices = @transform_1, window_bounds = array<i64: 128, 8>}, {transform_indices = @transform_2, window_bounds = array<i64: 1, 8>}, {transform_indices = @transform_3, window_bounds = array<i64: 32, 8>}, {transform_indices = @transform_4, window_bounds = array<i64: 1, 2, 8>}]} {
    %c0_i32 = arith.constant 0 : i32
    %0 = arith.cmpi eq, %arg2, %c0_i32 : i32
    %1 = arith.extui %0 : i1 to i32
    %c0_i32_0 = arith.constant 0 : i32
    %2 = arith.cmpi ne, %1, %c0_i32_0 : i32
    scf.if %2 {
      %cst_10 = arith.constant 0.000000e+00 : f32
      %12 = vector.broadcast %cst_10 : f32 to vector<32x8xf32>
      %c0_11 = arith.constant 0 : index
      %c0_12 = arith.constant 0 : index
      %13 = vector.load %arg8[%c0_11, %c0_12] : memref<32x8xf32, #tpu.memory_space<vmem>>, vector<32x8xf32>
      tpu.vector_store %arg8[%c0_11, %c0_12], %12 {strides = array<i32>} : memref<32x8xf32, #tpu.memory_space<vmem>>, vector<32x8xf32>,
    } else {
    }
    %c0 = arith.constant 0 : index
    %c0_1 = arith.constant 0 : index
    %3 = vector.load %arg8[%c0, %c0_1] : memref<32x8xf32, #tpu.memory_space<vmem>>, vector<32x8xf32>
    %c0_2 = arith.constant 0 : index
    %c0_3 = arith.constant 0 : index
    %4 = vector.load %arg3[%c0_2, %c0_3] : memref<32x128xbf16, #tpu.memory_space<vmem>>, vector<32x128xbf16>
    %c0_4 = arith.constant 0 : index
    %c0_5 = arith.constant 0 : index
    %5 = vector.load %arg4[%c0_4, %c0_5] : memref<128x8xbf16, #tpu.memory_space<vmem>>, vector<128x8xbf16>
    %cst = arith.constant dense<0.000000e+00> : vector<32x8xf32>
    %6 = tpu.matmul %4, %5, %cst {dimension_numbers = #tpu.dot_dimension_numbers<[1], [0], [0], [1], [0, 0, 1, 1], [], []>} : vector<32x128xbf16>, vector<128x8xbf16>, vector<32x8xf32> -> vector<32x8xf32>
    %7 = arith.addf %3, %6 : vector<32x8xf32>
    %c0_6 = arith.constant 0 : index
    %c0_7 = arith.constant 0 : index
    %8 = vector.load %arg8[%c0_6, %c0_7] : memref<32x8xf32, #tpu.memory_space<vmem>>, vector<32x8xf32>
    tpu.vector_store %arg8[%c0_6, %c0_7], %7 {strides = array<i32>} : memref<32x8xf32, #tpu.memory_space<vmem>>, vector<32x8xf32>,
    %c0_i32_8 = arith.constant 0 : i32
    %9 = arith.cmpi eq, %arg2, %c0_i32_8 : i32
    %10 = arith.extui %9 : i1 to i32
    %c0_i32_9 = arith.constant 0 : i32
    %11 = arith.cmpi ne, %10, %c0_i32_9 : i32
    scf.if %11 {
      %c0_10 = arith.constant 0 : index
      %c0_11 = arith.constant 0 : index
      %12 = vector.load %arg8[%c0_10, %c0_11] : memref<32x8xf32, #tpu.memory_space<vmem>>, vector<32x8xf32>
      %c0_12 = arith.constant 0 : index
      %c0_13 = arith.constant 0 : index
      %13 = vector.load %arg5[%c0_12, %c0_13] : memref<1x8xf32, #tpu.memory_space<vmem>>, vector<1x8xf32>
      %14 = vector.broadcast %13 : vector<1x8xf32> to vector<32x8xf32>
      %15 = arith.addf %12, %14 : vector<32x8xf32>
      %16 = arith.truncf %15 : vector<32x8xf32> to vector<32x8xbf16>
      %c0_14 = arith.constant 0 : index
      %c0_15 = arith.constant 0 : index
      %17 = vector.load %arg6[%c0_14, %c0_15] : memref<32x8xbf16, #tpu.memory_space<vmem>>, vector<32x8xbf16>
      tpu.vector_store %arg6[%c0_14, %c0_15], %16 {strides = array<i32>} : memref<32x8xbf16, #tpu.memory_space<vmem>>, vector<32x8xbf16>,
      %cst_16 = arith.constant dense<0.000000e+00> : vector<8xf32>
      %18 = vector.multi_reduction <add>, %15, %cst_16 [0] : vector<32x8xf32> to vector<8xf32>
      %19 = vector.shape_cast %18 : vector<8xf32> to vector<1x8xf32>
      %20 = arith.mulf %15, %15 : vector<32x8xf32>
      %cst_17 = arith.constant dense<0.000000e+00> : vector<8xf32>
      %21 = vector.multi_reduction <add>, %20, %cst_17 [0] : vector<32x8xf32> to vector<8xf32>
      %22 = vector.shape_cast %21 : vector<8xf32> to vector<1x8xf32>
      %23 = tpu.concatenate %19, %22 in 0 : vector<1x8xf32>, vector<1x8xf32> -> vector<2x8xf32>
      %24 = vector.shape_cast %23 : vector<2x8xf32> to vector<1x2x8xf32>
      %c0_18 = arith.constant 0 : index
      %c0_19 = arith.constant 0 : index
      %c0_20 = arith.constant 0 : index
      %25 = vector.load %arg7[%c0_18, %c0_19, %c0_20] : memref<1x2x8xf32, #tpu.memory_space<vmem>>, vector<1x2x8xf32>
      tpu.vector_store %arg7[%c0_18, %c0_19, %c0_20], %24 {strides = array<i32>} : memref<1x2x8xf32, #tpu.memory_space<vmem>>, vector<1x2x8xf32>,
    } else {
    }
    return
  }
  func.func @transform_0(%arg0: i32, %arg1: i32, %arg2: i32) -> (i32, i32) {
    %c0_i32 = arith.constant 0 : i32
    return %arg0, %arg2 : i32, i32
  }
  func.func @transform_1(%arg0: i32, %arg1: i32, %arg2: i32) -> (i32, i32) {
    %c0_i32 = arith.constant 0 : i32
    return %arg2, %arg1 : i32, i32
  }
  func.func @transform_2(%arg0: i32, %arg1: i32, %arg2: i32) -> (i32, i32) {
    %c0_i32 = arith.constant 0 : i32
    %c0_i32_0 = arith.constant 0 : i32
    return %c0_i32, %arg1 : i32, i32
  }
  func.func @transform_3(%arg0: i32, %arg1: i32, %arg2: i32) -> (i32, i32) {
    %c0_i32 = arith.constant 0 : i32
    return %arg0, %arg1 : i32, i32
  }
  func.func @transform_4(%arg0: i32, %arg1: i32, %arg2: i32) -> (i32, i32, i32) {
    %c0_i32 = arith.constant 0 : i32
    %c0_i32_0 = arith.constant 0 : i32
    return %arg0, %c0_i32, %arg1 : i32, i32, i32
  }
}

</mosaic_0001>

<bundles_post_ra>
// kernel: _lambda_.1
= control target key start
LH: loop header
LB: loop body
LE: loop exit
PB: predicated region body
PF: predicated region fallthrough
CT: control target
= control target key end

     0   :  { %10 = vsyncpa [#allocation4], 0  ;;  %vm23_vm0 = vcmask 64512   ;;  %v385_v2 = vmov 0.0   ;;  %s492_s0 = inlined_call_operand.vmem [shape: bf16[32,128], index: 0, kind: input, shape index: {}]   ;;  %s493_s1 = inlined_call_operand.vmem [shape: bf16[128,8], index: 1, kind: input, shape index: {}]   ;;  %s494_s2 = inlined_call_operand.vmem [shape: f32[1,8], index: 2, kind: input, shape index: {}]   ;;  %s495_s3 = inlined_call_operand.hbm [shape: bf16[32,8], index: 3, kind: output, shape index: {0}]   ;;  %s496_s4 = inlined_call_operand.hbm [shape: f32[1,2,8], index: 4, kind: output, shape index: {1}]  }
   0x1   :  { %v327_v0 = vld [vmem:[%s493_s1] sm:$0xff]   ;;  %v328_v1 = vld [vmem:[%s493_s1 + $0x8] sm:$0xff]   ;;  %26 = vst.msk [vmem:[#allocation2 + $0x10] sm:$0xff] %vm23_vm0, %v385_v2  ;;  %24 = vst.msk [vmem:[#allocation2] sm:$0xff] %vm23_vm0, %v385_v2 }
   0x2   :  { %302 = vmatprep.subr.bf16.mxu0 %v327_v0  ;;  %25 = vst.msk [vmem:[#allocation2 + $0x8] sm:$0xff] %vm23_vm0, %v385_v2  ;;  %27 = vst.msk [vmem:[#allocation2 + $0x18] sm:$0xff] %vm23_vm0, %v385_v2  ;;  %v329_v3 = vld [vmem:[%s493_s1 + $0x10] sm:$0xff]   ;;  %v330_v4 = vld [vmem:[%s493_s1 + $0x18] sm:$0xff]  }
   0x3   :  { %303 = vmatpush3.bf16.msra.mxu0 %v327_v0  ;;  %v335_v5 = vld [vmem:[%s492_s0] sm:$0xff]  }
   0x4   :  { %304 = vmatprep.subr.bf16.mxu0 %v328_v1  ;;  %318 = vmatprep.mubr.bf16.mxu0 %v335_v5 }
   0x7   :  { %305 = vmatpush3.bf16.msra.mxu0 %v328_v1 }
   0x8   :  { %306 = vmatprep.subr.bf16.mxu0 %v329_v3 }
   0x9   :  { %11 = vsyncpa [#allocation6], 0  ;;  %v331_v6 = vld [vmem:[%s493_s1 + $0x20] sm:$0xff]   ;;  %v332_v7 = vld [vmem:[%s493_s1 + $0x28] sm:$0xff]   ;;  %vm204_vm1 = vcmask 60416   ;;  %s386_s9 = smov [#allocation3]  }
   0xa   :  { %v333_v8 = vld [vmem:[%s493_s1 + $0x30] sm:$0xff]   ;;  %v334_v9 = vld [vmem:[%s493_s1 + $0x38] sm:$0xff]   ;;  %v336_v10 = vld [vmem:[%s492_s0 + $0x8] sm:$0xff]   ;;  %s248_s10 = sshll.u32 %s386_s9, 4  ;;  %s249_s10 = int_to_ptr.vmem [resolvable:$true] %s248_s10 }
   0xb   :  { %307 = vmatpush3.bf16.msra.mxu0 %v329_v3  ;;  %v30_v11 = vld [vmem:[#allocation2 + $0x10] sm:$0xff]  ;;  %v28_v12 = vld [vmem:[#allocation2] sm:$0xff]  ;;  %v31_v14 = vld [vmem:[#allocation2 + $0x18] sm:$0xff]  ;;  %p342_p1 = scmp.lt.s32.totalorder %s249_s10, %s249_s10 }
   0xc   :  { %308 = vmatprep.subr.bf16.mxu0 %v330_v4  ;;  %v29_v17 = vld [vmem:[#allocation2 + $0x8] sm:$0xff]  ;;  %v283_v23 = vld [vmem:[%s494_s2] ss:$0 sm:$0xff]  ;;  %s337_s2 = scalar_lea.vmem %s249_s10, 256 }
   0xd   :  { %p338_p0 = scmp.ne.s32.totalorder %s249_s10, %s337_s2  ;;  %p343_p2 = scmp.lt.s32.totalorder %s337_s2, %s337_s2 }
   0xf   :  { %309 = vmatpush3.bf16.msra.mxu0 %v330_v4  ;;  %p344_p3 = por %p343_p2, %p342_p1 }
  0x10   :  { %310 = vmatprep.subr.bf16.mxu0 %v331_v6 }
  0x11   :  { %p345_p4 = pnand %p344_p3, %p338_p0 }
  0x13   :  { %311 = vmatpush3.bf16.msra.mxu0 %v331_v6 }
  0x14   :  { %312 = vmatprep.subr.bf16.mxu0 %v332_v7 }
  0x17   :  { %313 = vmatpush3.bf16.msra.mxu0 %v332_v7 }
  0x18   :  { %314 = vmatprep.subr.bf16.mxu0 %v333_v8 }
  0x1b   :  { %315 = vmatpush3.bf16.msra.mxu0 %v333_v8 }
  0x1c   :  { %316 = vmatprep.subr.bf16.mxu0 %v334_v9 }
  0x1f   :  { %317 = vmatpush3.bf16.msra.mxu0 %v334_v9 }
  0x22   :  { %319 = vmatmul.mubr.bf16.vlgmr.msra.gmra.mrb[0].mxu0 %v336_v10 }
  0xf5   :  { %v320_v13 = vpop.f32.mrb[0].mxu0 }
  0xf6   :  { %v163_v15 = vadd.f32 %v320_v13, %v30_v11  ;;  %v146_v16 = vpop.f32.mrb[1].mxu0 }
  0xf7   :  { %v161_v18 = vadd.f32 %v146_v16, %v28_v12  ;;  %v321_v19 = vpop.f32.mrb[2].mxu0 }
  0xf8   :  { %168 = vst.msk [vmem:[#allocation2 + $0x10] sm:$0xff] %vm23_vm0, %v163_v15  ;;  %v164_v20 = vadd.f32 %v321_v19, %v31_v14  ;;  %v149_v21 = vpop.f32.mrb[3].mxu0 }
  0xf9   :  { %166 = vst.msk [vmem:[#allocation2] sm:$0xff] %vm23_vm0, %v161_v18  ;;  %v162_v22 = vadd.f32 %v149_v21, %v29_v17 }
  0xfa   :  { %169 = vst.msk [vmem:[#allocation2 + $0x18] sm:$0xff] %vm23_vm0, %v164_v20 }
  0xfb   :  { %167 = vst.msk [vmem:[#allocation2 + $0x8] sm:$0xff] %vm23_vm0, %v162_v22 }
  0xff   :  { %v175_v24 = vld [vmem:[#allocation2 + $0x10] sm:$0xff] }
 0x100   :  { %v173_v25 = vld [vmem:[#allocation2] sm:$0xff]  ;;  %v186_v26 = vadd.f32 %v283_v23, %v175_v24 }
 0x101   :  { %v176_v27 = vld [vmem:[#allocation2 + $0x18] sm:$0xff]  ;;  %v184_v28 = vadd.f32 %v283_v23, %v173_v25 }
 0x102   :  { %v174_v29 = vld [vmem:[#allocation2 + $0x8] sm:$0xff]  ;;  %v187_v30 = vadd.f32 %v283_v23, %v176_v27  ;;  %v290_v31 = vpack.c.bf16 %v186_v26, %v186_v26  ;;  %v224_v36 = vmul.f32 %v186_v26, %v186_v26  ;;  %v212_v42 = vsel %vm23_vm0, %v186_v26, 0.0 }
 0x103   :  { %v185_v32 = vadd.f32 %v283_v23, %v174_v29  ;;  %v288_v33 = vpack.c.bf16 %v184_v28, %v184_v28  ;;  %v222_v34 = vmul.f32 %v184_v28, %v184_v28  ;;  %v209_v38 = vsel %vm23_vm0, %v184_v28, 0.0 }
 0x104   :  { %v291_v35 = vpack.c.bf16 %v187_v30, %v187_v30  ;;  %207 = vst.msk [vmem:[#allocation3 + $0x8] sm:$0xf] %vm204_vm1, %v290_v31  ;;  %v225_v43 = vmul.f32 %v187_v30, %v187_v30 }
 0x105   :  { %v289_v37 = vpack.c.bf16 %v185_v32, %v185_v32  ;;  %205 = vst.msk [vmem:[#allocation3] sm:$0xf] %vm204_vm1, %v288_v33  ;;  %v210_v39 = vsel %vm23_vm0, %v185_v32, 0.0  ;;  %v223_v40 = vmul.f32 %v185_v32, %v185_v32  ;;  %v226_v44 = vsel %vm23_vm0, %v222_v34, 0.0 }
 0x106   :  { %208 = vst.msk [vmem:[#allocation3 + $0xc] sm:$0xf] %vm204_vm1, %v291_v35  ;;  %v211_v41 = vadd.f32 %v210_v39, %v209_v38 }
 0x107   :  { %206 = vst.msk [vmem:[#allocation3 + $0x4] sm:$0xf] %vm204_vm1, %v289_v37  ;;  %v227_v45 = vsel %vm23_vm0, %v223_v40, 0.0 }
 0x108   :  { %348 = shalt.err (!%p345_p4)
}
 0x109   :  { %s349_s13 = scalar_lea.hbm %s495_s3, 256 }
 0x10a   :  { %p350_p5 = scmp.ne.s32.totalorder %s495_s3, %s349_s13  ;;  %p353_p6 = scmp.lt.u32.totalorder %s349_s13, %s495_s3 }
 0x10c   :  { %p355_p7 = pnand %p353_p6, %p350_p5 }
 0x10e   :  { %358 = shalt.err (!%p355_p7)
}
 0x10f   :  { %s387_s18 = smov 64   ;;  %s388_s19 = smov 4   ;;  %v213_v46 = vadd.f32 %v212_v42, %v211_v41  ;;  %v228_v47 = vadd.f32 %v227_v45, %v226_v44  ;;  %v214_v48 = vsel %vm23_vm0, %v187_v30, 0.0  ;;  %v229_v49 = vsel %vm23_vm0, %v224_v36, 0.0 }
 0x110   :  { %254 = dma.vmem_to_hbm [thread:$0]  %s249_s10, 256, %s495_s3, [#allocation4], %s387_s18, %s387_s18, %s388_s19   ;;  %v231_v52 = vsel %vm23_vm0, %v225_v43, 0.0  ;;  %vm239_vm2 = vcmask 1040384   ;;  %vm241_vm3 = vcmask 58368  }
 0x111   :  { %v215_v50 = vadd.f32 %v214_v48, %v213_v46  ;;  %v230_v51 = vadd.f32 %v229_v49, %v228_v47  ;;  %s389_s3 = smov [#allocation5]  }
 0x112   :  { %s261_s22 = sshll.u32 %s389_s3, 4  ;;  %s262_s22 = int_to_ptr.vmem [resolvable:$true] %s261_s22 }
 0x113   :  { %v216_v53 = vrot.slane %v215_v50, 4  ;;  %v232_v54 = vadd.f32 %v231_v52, %v230_v51  ;;  %s359_s23 = scalar_lea.vmem %s262_s22, 32  ;;  %p364_p9 = scmp.lt.s32.totalorder %s262_s22, %s262_s22 }
 0x114   :  { %p360_p8 = scmp.ne.s32.totalorder %s262_s22, %s359_s23  ;;  %p365_p10 = scmp.lt.s32.totalorder %s359_s23, %s359_s23 }
 0x115   :  { %v217_v55 = vadd.f32 %v216_v53, %v215_v50  ;;  %v233_v56 = vrot.slane %v232_v54, 4 }
 0x116   :  { %p366_p11 = por %p365_p10, %p364_p9 }
 0x117   :  { %v218_v57 = vrot.slane %v217_v55, 2  ;;  %v234_v58 = vadd.f32 %v233_v56, %v232_v54 }
 0x118   :  { %p367_p12 = pnand %p366_p11, %p360_p8 }
 0x119   :  { %v219_v59 = vadd.f32 %v218_v57, %v217_v55  ;;  %v235_v60 = vrot.slane %v234_v58, 2 }
 0x11b   :  { %v220_v61 = vrot.slane %v219_v59, 1  ;;  %v236_v62 = vadd.f32 %v235_v60, %v234_v58 }
 0x11d   :  { %v237_v63 = vrot.slane %v236_v62, 1  ;;  %v221_v0 = vadd.f32 %v220_v61, %v219_v59 }
 0x11f   :  { %v238_v1 = vadd.f32 %v237_v63, %v236_v62 }
 0x121   :  { %v240_v2 = vsel %vm239_vm2, %v221_v0, %v238_v1 }
 0x122   :  { %242 = vst.msk [vmem:[#allocation5] sm:$0x3] %vm241_vm3, %v240_v2 }
 0x123   :  { %370 = shalt.err (!%p367_p12)
}
 0x124   :  { %s371_s26 = scalar_lea.hbm %s496_s4, 32 }
 0x125   :  { %p372_p13 = scmp.ne.s32.totalorder %s496_s4, %s371_s26  ;;  %p375_p0 = scmp.lt.u32.totalorder %s371_s26, %s496_s4 }
 0x127   :  { %p377_p1 = pnand %p375_p0, %p372_p13 }
 0x129   :  { %380 = shalt.err (!%p377_p1)
}
 0x12a   :  { %264 = dma.vmem_to_hbm [thread:$0]  %s262_s22, 32, %s496_s4, [#allocation6]  }
 0x12b   :  { %381 = dma.done.wait [#allocation4], 256  }
 0x12c   :  { %382 = vsyncadd [#allocation4], 4294967040 }
 0x12d   :  { %383 = dma.done.wait [#allocation6], 32  }
 0x12e   :  { %384 = vsyncadd [#allocation6], 4294967264 }
 0x12f   :  { %271 = vsyncpa [#allocation4], 1 }
 0x130   :  { %272 = vsyncpa [#allocation6], 1 }

</bundles_post_ra>
